<compile_context>
chip_gen: v6e
topology: v6e:2x2x1
jax: 0.10.0
libtpu: 0.0.40
codegen_flags: <defaults>
</compile_context>

<pallas_src>
import math
import functools

import jax
import jax.numpy as jnp
from jax import lax
from jax.experimental import pallas as pl
from jax.experimental.pallas import tpu as pltpu


def _round_up(x: int, m: int) -> int:
    return ((x + m - 1) // m) * m


def _linear_kernel(x_ref, w_ref, b_ref, o_ref, *, compute_dtype):
    # x_ref: (TM, K)   activation tile
    # w_ref: (TN, K)   weight tile, PyTorch (out_dim, in_dim) layout
    # b_ref: (1, TN)   bias tile
    # o_ref: (TM, TN)  output tile
    x = x_ref[...]
    w = w_ref[...]
    if compute_dtype is not None:
        x = x.astype(compute_dtype)
        w = w.astype(compute_dtype)
    # Contract the in_dim axis of both operands: y = x @ W^T on the MXU,
    # f32 accumulation regardless of input dtype.
    acc = lax.dot_general(
        x, w,
        dimension_numbers=(((1,), (1,)), ((), ())),
        preferred_element_type=jnp.float32,
    )
    o_ref[...] = (acc + b_ref[...].astype(jnp.float32)).astype(o_ref.dtype)


@functools.partial(jax.jit, static_argnames=("use_bias", "compute_dtype"))
def linear_norm_forward(x, weight, bias=None, use_bias=True, compute_dtype=None):
    """y = x @ weight.T + bias, matching nn.Linear semantics.

    x:      (..., in_dim)
    weight: (out_dim, in_dim)   (PyTorch storage convention, NOT transposed)
    bias:   (out_dim,) or None
    compute_dtype: optional dtype (e.g. jnp.bfloat16) for the MXU operands.
    """
    in_dim = x.shape[-1]
    out_dim = weight.shape[0]
    lead_shape = x.shape[:-1]
    m = 1
    for d in lead_shape:
        m *= d

    out_dtype = x.dtype
    x2d = x.reshape(m, in_dim)

    # ---- bias handling (single kernel path; zero bias when unused) ----
    if use_bias and bias is not None:
        b1d = bias
    else:
        b1d = jnp.zeros((out_dim,), dtype=jnp.float32)

    # ---- tile / padding plan ----------------------------------------
    # M tile: multiple of 8 (f32 sublane), capped at 512 rows.
    m_pad8 = _round_up(max(m, 1), 8)
    tm = 512 if m_pad8 >= 512 else m_pad8
    m_pad = _round_up(max(m, 1), tm)

    # N tile: 128-lane aligned so output stores are unmasked vst.
    n_pad = _round_up(out_dim, 128)
    tn = 128
    for cand in (512, 384, 256, 128):
        if n_pad % cand == 0:
            tn = cand
            break

    k = in_dim  # untiled reduction dim (block == full array dim is legal)

    # ---- pad operands to the tiled shapes ----------------------------
    if m_pad != m:
        x2d = jnp.pad(x2d, ((0, m_pad - m), (0, 0)))
    w_p = weight
    if n_pad != out_dim:
        w_p = jnp.pad(w_p, ((0, n_pad - out_dim), (0, 0)))
    b_p = b1d
    if n_pad != out_dim:
        b_p = jnp.pad(b_p, ((0, n_pad - out_dim),))
    b2d = b_p.reshape(1, n_pad)

    grid = (m_pad // tm, n_pad // tn)

    # ---- VMEM budget (double-buffered inputs + output), with headroom ----
    itemsize = 4
    vmem_est = 2 * itemsize * (tm * k + tn * k + tn + tm * tn)
    vmem_limit = int(min(max(2 * vmem_est, 16 * 1024 * 1024), 48 * 1024 * 1024))

    cost = pl.CostEstimate(
        flops=2 * m * k * out_dim,
        transcendentals=0,
        bytes_accessed=itemsize * (m * k + out_dim * k + out_dim + m * out_dim),
    )

    kernel = functools.partial(_linear_kernel, compute_dtype=compute_dtype)

    out2d = pl.pallas_call(
        kernel,
        out_shape=jax.ShapeDtypeStruct((m_pad, n_pad), out_dtype),
        grid_spec=pltpu.PrefetchScalarGridSpec(
            num_scalar_prefetch=0,
            grid=grid,
            in_specs=[
                pl.BlockSpec((tm, k), lambda i, j: (i, 0)),   # x tile
                pl.BlockSpec((tn, k), lambda i, j: (j, 0)),   # W tile (out_dim major)
                pl.BlockSpec((1, tn), lambda i, j: (0, j)),   # bias tile
            ],
            out_specs=pl.BlockSpec((tm, tn), lambda i, j: (i, j)),
        ),
        compiler_params=pltpu.CompilerParams(
            dimension_semantics=("parallel", "parallel"),
            vmem_limit_bytes=vmem_limit,
        ),
        cost_estimate=cost,
    )(x2d, w_p, b2d)

    return out2d[:m, :out_dim].reshape(*lead_shape, out_dim)


def init_linear_norm_params(key, in_dim, out_dim, bias=True, w_init_gain="linear"):
    """Matches LinearNorm.__init__:
    - weight: xavier_uniform_ with gain = calculate_gain(w_init_gain)
    - bias:   PyTorch nn.Linear default: U(-1/sqrt(in_dim), 1/sqrt(in_dim))
    """
    gains = {"linear": 1.0, "relu": math.sqrt(2.0), "tanh": 5.0 / 3.0, "sigmoid": 1.0}
    gain = gains.get(w_init_gain, 1.0)
    wkey, bkey = jax.random.split(key)
    bound_w = gain * math.sqrt(6.0 / (in_dim + out_dim))
    weight = jax.random.uniform(
        wkey, (out_dim, in_dim), dtype=jnp.float32, minval=-bound_w, maxval=bound_w
    )
    if bias:
        bound_b = 1.0 / math.sqrt(in_dim)
        b = jax.random.uniform(
            bkey, (out_dim,), dtype=jnp.float32, minval=-bound_b, maxval=bound_b
        )
    else:
        b = None
    return weight, b


if __name__ == "__main__":
    key = jax.random.PRNGKey(0)
    xkey, pkey = jax.random.split(key)

    batch, seq, in_dim, out_dim = 2, 8, 32, 64
    x = jax.random.normal(xkey, (batch, seq, in_dim), dtype=jnp.float32)

    weight, bias = init_linear_norm_params(
        pkey, in_dim, out_dim, bias=True, w_init_gain="linear"
    )

    # with bias
    y = linear_norm_forward(x, weight, bias, use_bias=True)
    y = jax.block_until_ready(y)
    y_ref = x @ weight.T + bias
    assert y.shape == (batch, seq, out_dim)
    assert jnp.allclose(y, y_ref, atol=1e-5, rtol=1e-5)

    # without bias (exercises the zero-bias single-kernel path)
    y_nb = linear_norm_forward(x, weight, None, use_bias=False)
    y_nb = jax.block_until_ready(y_nb)
    assert jnp.allclose(y_nb, x @ weight.T, atol=1e-5, rtol=1e-5)

    print("KERNEL_OK")
</pallas_src>

<mosaic_0001>
module attributes {stable_mosaic.version = 11 : i64} {
  func.func @_linear_kernel(%arg0: i32, %arg1: i32, %arg2: memref<16x32xf32, #tpu.memory_space<vmem>>, %arg3: memref<128x32xf32, #tpu.memory_space<vmem>>, %arg4: memref<1x128xf32, #tpu.memory_space<vmem>>, %arg5: memref<16x128xf32, #tpu.memory_space<vmem>>) attributes {dimension_semantics = [#tpu.dimension_semantics<parallel>, #tpu.dimension_semantics<parallel>], iteration_bounds = array<i64: 1, 1>, scalar_prefetch = 0 : i64, scratch_operands = 0 : i64, tpu.core_type = #tpu.core_type<tc>, window_params = [{transform_indices = @transform_0, window_bounds = array<i64: 16, 32>}, {transform_indices = @transform_1, window_bounds = array<i64: 128, 32>}, {transform_indices = @transform_2, window_bounds = array<i64: 1, 128>}, {transform_indices = @transform_3, window_bounds = array<i64: 16, 128>}]} {
    %c0 = arith.constant 0 : index
    %c0_0 = arith.constant 0 : index
    %0 = vector.load %arg2[%c0, %c0_0] : memref<16x32xf32, #tpu.memory_space<vmem>>, vector<16x32xf32>
    %c0_1 = arith.constant 0 : index
    %c0_2 = arith.constant 0 : index
    %1 = vector.load %arg3[%c0_1, %c0_2] : memref<128x32xf32, #tpu.memory_space<vmem>>, vector<128x32xf32>
    %cst = arith.constant dense<0.000000e+00> : vector<16x128xf32>
    %2 = tpu.matmul %0, %1, %cst {dimension_numbers = #tpu.dot_dimension_numbers<[1], [1], [0], [0], [0, 0, 1, 0], [], []>} : vector<16x32xf32>, vector<128x32xf32>, vector<16x128xf32> -> vector<16x128xf32>
    %c0_3 = arith.constant 0 : index
    %c0_4 = arith.constant 0 : index
    %3 = vector.load %arg4[%c0_3, %c0_4] : memref<1x128xf32, #tpu.memory_space<vmem>>, vector<1x128xf32>
    %4 = vector.broadcast %3 : vector<1x128xf32> to vector<16x128xf32>
    %5 = arith.addf %2, %4 : vector<16x128xf32>
    %c0_5 = arith.constant 0 : index
    %c0_6 = arith.constant 0 : index
    %6 = vector.load %arg5[%c0_5, %c0_6] : memref<16x128xf32, #tpu.memory_space<vmem>>, vector<16x128xf32>
    tpu.vector_store %arg5[%c0_5, %c0_6], %5 {strides = array<i32>} : memref<16x128xf32, #tpu.memory_space<vmem>>, vector<16x128xf32>,
    return
  }
  func.func @transform_0(%arg0: i32, %arg1: i32) -> (i32, i32) {
    %c0_i32 = arith.constant 0 : i32
    %c0_i32_0 = arith.constant 0 : i32
    return %arg0, %c0_i32 : i32, i32
  }
  func.func @transform_1(%arg0: i32, %arg1: i32) -> (i32, i32) {
    %c0_i32 = arith.constant 0 : i32
    %c0_i32_0 = arith.constant 0 : i32
    return %arg1, %c0_i32 : i32, i32
  }
  func.func @transform_2(%arg0: i32, %arg1: i32) -> (i32, i32) {
    %c0_i32 = arith.constant 0 : i32
    %c0_i32_0 = arith.constant 0 : i32
    return %c0_i32, %arg1 : i32, i32
  }
  func.func @transform_3(%arg0: i32, %arg1: i32) -> (i32, i32) {
    %c0_i32 = arith.constant 0 : i32
    return %arg0, %arg1 : i32, i32
  }
}

</mosaic_0001>

<bundles_post_ra>
// kernel: linear_norm_forward.1
= control target key start
LH: loop header
LB: loop body
LE: loop exit
PB: predicated region body
PF: predicated region fallthrough
CT: control target
= control target key end

     0   :  { %vm39_vm0 = vcmask 261120   ;;  %s364_s1 = inlined_call_operand.vmem [shape: f32[128,32], index: 1, kind: input, shape index: {}]   ;;  %s365_s0 = inlined_call_operand.vmem [shape: f32[16,32], index: 0, kind: input, shape index: {}]   ;;  %s366_s2 = inlined_call_operand.vmem [shape: f32[1,128], index: 2, kind: input, shape index: {}]   ;;  %s367_s3 = inlined_call_operand.vmem [shape: f32[16,128], index: 3, kind: output, shape index: {}]  }
   0x1   :  { %v31_v0 = vld [vmem:[%s364_s1 + $0x78] sm:$0xff]  ;;  %v30_v1 = vld [vmem:[%s364_s1 + $0x70] sm:$0xff]  ;;  %v29_v2 = vld [vmem:[%s364_s1 + $0x68] sm:$0xff] }
   0x2   :  { %212 = vmatprep.subr.msk.mxu0 %vm39_vm0, %v31_v0  ;;  %v14_v3 = vld [vmem:[%s365_s0] sm:$0xff]  ;;  %v27_v5 = vld [vmem:[%s364_s1 + $0x58] sm:$0xff]  ;;  %v26_v6 = vld [vmem:[%s364_s1 + $0x50] sm:$0xff] }
   0x3   :  { %213 = vmatpush3.xpose.msk.msra.mxu0 %vm39_vm0, %v31_v0  ;;  %244 = vmatprep.mubr.msk.f32.mxu0 %vm39_vm0, %v14_v3  ;;  %v28_v4 = vld [vmem:[%s364_s1 + $0x60] sm:$0xff]  ;;  %v25_v7 = vld [vmem:[%s364_s1 + $0x48] sm:$0xff]  ;;  %v23_v9 = vld [vmem:[%s364_s1 + $0x38] sm:$0xff] }
   0x4   :  { %214 = vmatprep.subr.msk.mxu0 %vm39_vm0, %v30_v1  ;;  %v24_v8 = vld [vmem:[%s364_s1 + $0x40] sm:$0xff]  ;;  %v22_v10 = vld [vmem:[%s364_s1 + $0x30] sm:$0xff]  ;;  %v21_v11 = vld [vmem:[%s364_s1 + $0x28] sm:$0xff] }
   0x5   :  { %v20_v12 = vld [vmem:[%s364_s1 + $0x20] sm:$0xff]  ;;  %v19_v13 = vld [vmem:[%s364_s1 + $0x18] sm:$0xff]  ;;  %v18_v14 = vld [vmem:[%s364_s1 + $0x10] sm:$0xff] }
   0x6   :  { %v17_v15 = vld [vmem:[%s364_s1 + $0x8] sm:$0xff]  ;;  %v16_v16 = vld [vmem:[%s364_s1] sm:$0xff] }
   0x7   :  { %215 = vmatpush3.xpose.msk.msra.mxu0 %vm39_vm0, %v30_v1  ;;  %v15_v17 = vld [vmem:[%s365_s0 + $0x8] sm:$0xff]  ;;  %v175_v18 = vld [vmem:[%s366_s2] ss:$0 sm:$0xff] }
   0x8   :  { %216 = vmatprep.subr.msk.mxu0 %vm39_vm0, %v29_v2 }
   0xb   :  { %217 = vmatpush3.xpose.msk.msra.mxu0 %vm39_vm0, %v29_v2 }
   0xc   :  { %218 = vmatprep.subr.msk.mxu0 %vm39_vm0, %v28_v4 }
   0xf   :  { %219 = vmatpush3.xpose.msk.msra.mxu0 %vm39_vm0, %v28_v4 }
  0x10   :  { %220 = vmatprep.subr.msk.mxu0 %vm39_vm0, %v27_v5 }
  0x13   :  { %221 = vmatpush3.xpose.msk.msra.mxu0 %vm39_vm0, %v27_v5 }
  0x14   :  { %222 = vmatprep.subr.msk.mxu0 %vm39_vm0, %v26_v6 }
  0x17   :  { %223 = vmatpush3.xpose.msk.msra.mxu0 %vm39_vm0, %v26_v6 }
  0x18   :  { %224 = vmatprep.subr.msk.mxu0 %vm39_vm0, %v25_v7 }
  0x1b   :  { %225 = vmatpush3.xpose.msk.msra.mxu0 %vm39_vm0, %v25_v7 }
  0x1c   :  { %226 = vmatprep.subr.msk.mxu0 %vm39_vm0, %v24_v8 }
  0x1f   :  { %227 = vmatpush3.xpose.msk.msra.mxu0 %vm39_vm0, %v24_v8 }
  0x20   :  { %228 = vmatprep.subr.msk.mxu0 %vm39_vm0, %v23_v9 }
  0x23   :  { %229 = vmatpush3.xpose.msk.msra.mxu0 %vm39_vm0, %v23_v9 }
  0x24   :  { %230 = vmatprep.subr.msk.mxu0 %vm39_vm0, %v22_v10 }
  0x27   :  { %231 = vmatpush3.xpose.msk.msra.mxu0 %vm39_vm0, %v22_v10 }
  0x28   :  { %232 = vmatprep.subr.msk.mxu0 %vm39_vm0, %v21_v11 }
  0x2b   :  { %233 = vmatpush3.xpose.msk.msra.mxu0 %vm39_vm0, %v21_v11 }
  0x2c   :  { %234 = vmatprep.subr.msk.mxu0 %vm39_vm0, %v20_v12 }
  0x2f   :  { %235 = vmatpush3.xpose.msk.msra.mxu0 %vm39_vm0, %v20_v12 }
  0x30   :  { %236 = vmatprep.subr.msk.mxu0 %vm39_vm0, %v19_v13 }
  0x33   :  { %237 = vmatpush3.xpose.msk.msra.mxu0 %vm39_vm0, %v19_v13 }
  0x34   :  { %238 = vmatprep.subr.msk.mxu0 %vm39_vm0, %v18_v14 }
  0x37   :  { %239 = vmatpush3.xpose.msk.msra.mxu0 %vm39_vm0, %v18_v14 }
  0x38   :  { %240 = vmatprep.subr.msk.mxu0 %vm39_vm0, %v17_v15 }
  0x3b   :  { %241 = vmatpush3.xpose.msk.msra.mxu0 %vm39_vm0, %v17_v15 }
  0x3c   :  { %242 = vmatprep.subr.msk.mxu0 %vm39_vm0, %v16_v16 }
  0x3f   :  { %243 = vmatpush3.xpose.msk.msra.mxu0 %vm39_vm0, %v16_v16 }
  0x42   :  { %245 = vmatmul.mubr.msk.f32.vlgmr.msra.gmra.mxu0 %vm39_vm0, %v15_v17 }
 0x102   :  { %v246_v19 = vpop.f32.mrf.mxu0 }
 0x103   :  { %v166_v20 = vadd.f32 %v246_v19, %v175_v18 }
 0x104   :  { %v160_v21 = vpop.f32.mrf.mxu0 }
 0x105   :  { %170 = vst [vmem:[%s367_s3 + $0x8] sm:$0xff] %v166_v20  ;;  %v161_v22 = vadd.f32 %v175_v18, %v160_v21 }
 0x107   :  { %169 = vst [vmem:[%s367_s3] sm:$0xff] %v161_v22 }

</bundles_post_ra>
